<compile_context>
chip_gen: v7x
topology: tpu7x:2x2x1
jax: 0.10.0
libtpu: 0.0.40
codegen_flags: <defaults>
</compile_context>

<pallas_src>
import jax
import jax.numpy as jnp
from jax.experimental import pallas as pl
from jax.experimental.pallas import tpu as pltpu

_LANES = 128
_TARGET_TILE_BYTES = 4 * 1024 * 1024   # ~4 MiB blocks; x4 (in+out, double-buffered)
_VMEM_LIMIT_BYTES = 32 * 1024 * 1024   # safe on v5e / v6e / v7x scoped VMEM


def _identity_kernel(x_ref, o_ref):
    # Pure pass-through: copy the VMEM tile (output HBM buffer aliases input).
    o_ref[...] = x_ref[...]


@jax.jit
def identity(x: jax.Array) -> jax.Array:
    """Pallas implementation of nn.Identity: returns inputs unchanged."""
    n = x.size
    if n == 0:
        return x  # empty input: nothing to do

    itemsize = jnp.dtype(x.dtype).itemsize
    # dtype-aware sublane multiple: 8 for 4-byte, 16 for 2-byte, 32 for 1-byte
    sublane = max(8, 32 // max(1, itemsize))

    # Pick the widest lane-dense column count dividing the element count;
    # prefer one that also leaves a sublane-aligned row count.
    cols = None
    for c in (2048, 1024, 512, 256, 128):
        if n % c == 0 and (n // c) % sublane == 0:
            cols = c
            break
    if cols is None:
        for c in (2048, 1024, 512, 256, 128):
            if n % c == 0:
                cols = c
                break
    if cols is None:
        # No zero-copy lane-aligned view exists; Identity needs no work anyway.
        return x

    rows = n // cols
    x2d = x.reshape(rows, cols)            # pure reshape: no pad, no extra pass

    bytes_per_row = cols * itemsize
    if rows <= sublane:
        tile_r = rows                      # full-extent block (always legal)
    else:
        tile_r = min(rows, _TARGET_TILE_BYTES // bytes_per_row)
        tile_r = max(sublane, (tile_r // sublane) * sublane)
    grid = (pl.cdiv(rows, tile_r),)        # partial last block handled by Pallas

    out2d = pl.pallas_call(
        _identity_kernel,
        out_shape=jax.ShapeDtypeStruct((rows, cols), x.dtype),
        grid_spec=pltpu.PrefetchScalarGridSpec(
            num_scalar_prefetch=0,
            grid=grid,
            in_specs=[pl.BlockSpec((tile_r, cols), lambda i: (i, 0))],
            out_specs=pl.BlockSpec((tile_r, cols), lambda i: (i, 0)),
        ),
        # Output buffer is the input buffer: no new allocation and no extra
        # HBM traffic when fused into a larger jitted graph.
        input_output_aliases={0: 0},
        cost_estimate=pl.CostEstimate(
            flops=0, transcendentals=0, bytes_accessed=2 * n * itemsize),
        compiler_params=pltpu.CompilerParams(
            dimension_semantics=("parallel",),   # v7x: shard across both TCs
            vmem_limit_bytes=_VMEM_LIMIT_BYTES),
    )(x2d)

    return out2d.reshape(x.shape)


if __name__ == "__main__":
    key = jax.random.PRNGKey(0)
    x = jax.random.normal(key, (2, 4, 16, 16), dtype=jnp.float32)  # NCHW

    y = identity(x)
    jax.block_until_ready(y)

    assert y.shape == x.shape and y.dtype == x.dtype
    assert bool(jnp.all(y == x))
    print("KERNEL_OK")
</pallas_src>

<mosaic_0001>
module attributes {stable_mosaic.version = 11 : i64} {
  func.func @_identity_kernel(%arg0: i32, %arg1: memref<8x256xf32, #tpu.memory_space<vmem>>, %arg2: memref<8x256xf32, #tpu.memory_space<vmem>>) attributes {dimension_semantics = [#tpu.dimension_semantics<parallel>], iteration_bounds = array<i64: 1>, scalar_prefetch = 0 : i64, scratch_operands = 0 : i64, tpu.core_type = #tpu.core_type<tc>, window_params = [{transform_indices = @transform_0, window_bounds = array<i64: 8, 256>}, {transform_indices = @transform_1, window_bounds = array<i64: 8, 256>}]} {
    %c0 = arith.constant 0 : index
    %c0_0 = arith.constant 0 : index
    %0 = vector.load %arg1[%c0, %c0_0] : memref<8x256xf32, #tpu.memory_space<vmem>>, vector<8x256xf32>
    %c0_1 = arith.constant 0 : index
    %c0_2 = arith.constant 0 : index
    %1 = vector.load %arg2[%c0_1, %c0_2] : memref<8x256xf32, #tpu.memory_space<vmem>>, vector<8x256xf32>
    tpu.vector_store %arg2[%c0_1, %c0_2], %0 {strides = array<i32>} : memref<8x256xf32, #tpu.memory_space<vmem>>, vector<8x256xf32>,
    return
  }
  func.func @transform_0(%arg0: i32) -> (i32, i32) {
    %c0_i32 = arith.constant 0 : i32
    %c0_i32_0 = arith.constant 0 : i32
    return %arg0, %c0_i32 : i32, i32
  }
  func.func @transform_1(%arg0: i32) -> (i32, i32) {
    %c0_i32 = arith.constant 0 : i32
    %c0_i32_0 = arith.constant 0 : i32
    return %arg0, %c0_i32 : i32, i32
  }
}

</mosaic_0001>

<bundles_post_ra>
// kernel: identity.1
= control target key start
LH: loop header
LB: loop body
LE: loop exit
PB: predicated region body
PF: predicated region fallthrough
CT: control target
= control target key end

     0   :  { %s38_s0 = inlined_call_operand.vmem [shape: f32[8,256], index: 0, kind: input, shape index: {}, may-alias: {0,1}]   ;;  %s39_s1 = inlined_call_operand.vmem [shape: f32[8,256], index: 1, kind: output, shape index: {}, may-alias: {0,1}]  }
   0x1   :  { %v8_v0 = vld [vmem:[%s38_s0] sm:$0xff]  ;;  %v9_v1 = vld [vmem:[%s38_s0 + $0x8] sm:$0xff] }
   0x2   :  { %10 = vst [vmem:[%s39_s1] sm:$0xff] %v8_v0  ;;  %11 = vst [vmem:[%s39_s1 + $0x8] sm:$0xff] %v9_v1 }

</bundles_post_ra>
